<compile_context>
chip_gen: v7x
topology: tpu7x:2x2x1
jax: 0.10.0
libtpu: 0.0.40
codegen_flags: <defaults>
</compile_context>

<pallas_src>
import jax
import jax.numpy as jnp
from jax.experimental import pallas as pl
from jax.experimental.pallas import tpu as pltpu

_SUBLANES = 8
_ALIGN = _SUBLANES * 128  # batch elements covered by one (8, 128) f32 vreg


def _round_up(a, m):
    return -(-a // m) * m


def _logreg_kernel(w_ref, b_ref, xt_ref, o_ref):
    # w_ref : (F,)      f32 in SMEM
    # b_ref : (1,)      f32 in SMEM
    # xt_ref: (F*8, TC) input dtype in VMEM (feature f on rows 8f..8f+7,
    #                   batch spread densely over sublanes x lanes)
    # o_ref : (8, TC)   output dtype in VMEM (dense sublane x lane tile)
    f_dim = w_ref.shape[0]

    # Unrolled VPU GEMV over the small, static feature dim; scalar weights
    # come straight from SMEM and broadcast over the whole batch tile.
    z = w_ref[0] * xt_ref[0:_SUBLANES, :].astype(jnp.float32)
    for f in range(1, f_dim):
        rows = xt_ref[f * _SUBLANES:(f + 1) * _SUBLANES, :].astype(jnp.float32)
        z = z + w_ref[f] * rows
    z = z + b_ref[0]

    # Exact sigmoid via a single transcendental on the (single) EUP slot.
    o_ref[...] = (0.5 * jnp.tanh(0.5 * z) + 0.5).astype(o_ref.dtype)


def logistic_regression_forward(x, weight, bias, *, lane_tile=None,
                                out_dtype=jnp.float32):
    """x: (N, F); weight: (1, F) (PyTorch nn.Linear layout); bias: (1,).

    Returns sigmoid(x @ weight.T + bias) with shape (N, 1).
    """
    n, f = x.shape

    if lane_tile is None:
        # Target ~2 MiB of f32 input per grid step (F=2) to amortize the
        # fixed per-step cost; keep at least 2 grid steps so v7x's two
        # TensorCores both get work.
        target = 262144
        if n <= _ALIGN:
            lane_tile = _ALIGN
        else:
            half = _round_up(_round_up(n, _ALIGN) // 2, _ALIGN)
            lane_tile = min(target, half)
    lane_tile = _round_up(lane_tile, _ALIGN)
    n_pad = _round_up(n, lane_tile)
    tc = lane_tile // _SUBLANES          # lane width of one block
    m = n_pad // _SUBLANES               # columns of the (8, m) output layout

    # Feature-major, batch zero-padded, then folded so feature f sits on
    # sublanes 8f..8f+7 and the batch fills a dense sublane x lane grid.
    # (The transpose/pad is one extra XLA pass over the input; the reshapes
    #  below are metadata-only. Streaming x in its native dtype.)
    # TODO(synk): for huge N, fold the transpose/pad into the kernel (masked
    # ragged tail + in-register de-interleave) to avoid the extra HBM pass.
    xt = jnp.zeros((f, n_pad), dtype=x.dtype).at[:, :n].set(x.T)
    xt = xt.reshape(f, _SUBLANES, m).reshape(f * _SUBLANES, m)

    w = weight.reshape(f).astype(jnp.float32)
    b = bias.reshape(1).astype(jnp.float32)

    # Double-buffered VMEM footprint (+2x headroom), clamped to fit v7x's
    # 64 MiB physical VMEM; explicit so v5e's 16 MiB scoped default never bites.
    in_block = f * lane_tile * x.dtype.itemsize
    out_block = lane_tile * jnp.dtype(out_dtype).itemsize
    vmem_bytes = int(min(max(4 * (in_block + out_block), 4 << 20), 48 << 20))

    out = pl.pallas_call(
        _logreg_kernel,
        out_shape=jax.ShapeDtypeStruct((_SUBLANES, m), out_dtype),
        grid=(n_pad // lane_tile,),
        in_specs=[
            pl.BlockSpec(memory_space=pltpu.MemorySpace.SMEM),    # weight (F,)
            pl.BlockSpec(memory_space=pltpu.MemorySpace.SMEM),    # bias  (1,)
            pl.BlockSpec((f * _SUBLANES, tc), lambda i: (0, i)),  # x^T tile
        ],
        out_specs=pl.BlockSpec((_SUBLANES, tc), lambda i: (0, i)),
        compiler_params=pltpu.CompilerParams(
            dimension_semantics=("parallel",),
            vmem_limit_bytes=vmem_bytes,
        ),
    )(w, b, xt)

    # (8, m) -> (n_pad,) recovers batch order; drop padding, restore (N, 1).
    return out.reshape(n_pad)[:n].reshape(n, 1)


if __name__ == "__main__":
    # Same data as the PyTorch reference script.
    X = jnp.array([[1, 2], [2, 3], [3, 4], [4, 5], [5, 6], [6, 7]],
                  dtype=jnp.float32)
    n_input_features = X.shape[1]  # 2

    # Deterministic parameter init mimicking nn.Linear(n_input_features, 1):
    # uniform(-1/sqrt(fan_in), 1/sqrt(fan_in)) for both weight and bias.
    key = jax.random.PRNGKey(0)
    k_w, k_b, k_x = jax.random.split(key, 3)
    bound = 1.0 / jnp.sqrt(jnp.float32(n_input_features))
    weight = jax.random.uniform(k_w, (1, n_input_features), jnp.float32,
                                -bound, bound)
    bias = jax.random.uniform(k_b, (1,), jnp.float32, -bound, bound)

    # Case 1: the spec's 6x2 input (single padded tile).
    y = logistic_regression_forward(X, weight, bias)
    jax.block_until_ready(y)
    y_ref = jax.nn.sigmoid(X @ weight.T + bias)
    assert y.shape == (X.shape[0], 1)
    assert jnp.allclose(y, y_ref, atol=1e-4), float(jnp.max(jnp.abs(y - y_ref)))

    # Case 2: exercise the multi-block grid + ragged (zero-padded) last tile.
    X2 = 3.0 * jax.random.normal(k_x, (2500, n_input_features), jnp.float32)
    y2 = logistic_regression_forward(X2, weight, bias, lane_tile=1024)
    jax.block_until_ready(y2)
    y2_ref = jax.nn.sigmoid(X2 @ weight.T + bias)
    assert y2.shape == (X2.shape[0], 1)
    assert jnp.allclose(y2, y2_ref, atol=1e-4), float(jnp.max(jnp.abs(y2 - y2_ref)))

    print("KERNEL_OK")
</pallas_src>

<mosaic_0001>
module attributes {stable_mosaic.version = 11 : i64} {
  func.func @_logreg_kernel(%arg0: i32, %arg1: memref<2xf32, #tpu.memory_space<smem>>, %arg2: memref<1xf32, #tpu.memory_space<smem>>, %arg3: memref<16x128xf32, #tpu.memory_space<vmem>>, %arg4: memref<8x128xf32, #tpu.memory_space<vmem>>) attributes {dimension_semantics = [#tpu.dimension_semantics<parallel>], iteration_bounds = array<i64: 1>, scalar_prefetch = 0 : i64, scratch_operands = 0 : i64, tpu.core_type = #tpu.core_type<tc>, window_params = [{transform_indices = @transform_0, window_bounds = array<i64: 2>}, {transform_indices = @transform_1, window_bounds = array<i64: 1>}, {transform_indices = @transform_2, window_bounds = array<i64: 16, 128>}, {transform_indices = @transform_3, window_bounds = array<i64: 8, 128>}]} {
    %c0 = arith.constant 0 : index
    %0 = memref.load %arg1[%c0] : memref<2xf32, #tpu.memory_space<smem>>
    %c0_0 = arith.constant 0 : index
    %c0_1 = arith.constant 0 : index
    %1 = vector.load %arg3[%c0_0, %c0_1] : memref<16x128xf32, #tpu.memory_space<vmem>>, vector<8x128xf32>
    %2 = vector.broadcast %0 : f32 to vector<8x128xf32>
    %3 = arith.mulf %2, %1 : vector<8x128xf32>
    %c8 = arith.constant 8 : index
    %c0_2 = arith.constant 0 : index
    %4 = vector.load %arg3[%c8, %c0_2] : memref<16x128xf32, #tpu.memory_space<vmem>>, vector<8x128xf32>
    %c1 = arith.constant 1 : index
    %5 = memref.load %arg1[%c1] : memref<2xf32, #tpu.memory_space<smem>>
    %6 = vector.broadcast %5 : f32 to vector<8x128xf32>
    %7 = arith.mulf %6, %4 : vector<8x128xf32>
    %8 = arith.addf %3, %7 : vector<8x128xf32>
    %c0_3 = arith.constant 0 : index
    %9 = memref.load %arg2[%c0_3] : memref<1xf32, #tpu.memory_space<smem>>
    %10 = vector.broadcast %9 : f32 to vector<8x128xf32>
    %11 = arith.addf %8, %10 : vector<8x128xf32>
    %cst = arith.constant 5.000000e-01 : f32
    %12 = vector.broadcast %cst : f32 to vector<8x128xf32>
    %13 = arith.mulf %12, %11 : vector<8x128xf32>
    %14 = math.tanh %13 : vector<8x128xf32>
    %cst_4 = arith.constant 5.000000e-01 : f32
    %15 = vector.broadcast %cst_4 : f32 to vector<8x128xf32>
    %16 = arith.mulf %15, %14 : vector<8x128xf32>
    %cst_5 = arith.constant 5.000000e-01 : f32
    %17 = vector.broadcast %cst_5 : f32 to vector<8x128xf32>
    %18 = arith.addf %16, %17 : vector<8x128xf32>
    %c0_6 = arith.constant 0 : index
    %c0_7 = arith.constant 0 : index
    %19 = vector.load %arg4[%c0_6, %c0_7] : memref<8x128xf32, #tpu.memory_space<vmem>>, vector<8x128xf32>
    tpu.vector_store %arg4[%c0_6, %c0_7], %18 {strides = array<i32>} : memref<8x128xf32, #tpu.memory_space<vmem>>, vector<8x128xf32>,
    return
  }
  func.func @transform_0(%arg0: i32) -> i32 {
    %c0_i32 = arith.constant 0 : i32
    %c0_i32_0 = arith.constant 0 : i32
    return %c0_i32 : i32
  }
  func.func @transform_1(%arg0: i32) -> i32 {
    %c0_i32 = arith.constant 0 : i32
    %c0_i32_0 = arith.constant 0 : i32
    return %c0_i32 : i32
  }
  func.func @transform_2(%arg0: i32) -> (i32, i32) {
    %c0_i32 = arith.constant 0 : i32
    %c0_i32_0 = arith.constant 0 : i32
    return %c0_i32, %arg0 : i32, i32
  }
  func.func @transform_3(%arg0: i32) -> (i32, i32) {
    %c0_i32 = arith.constant 0 : i32
    %c0_i32_0 = arith.constant 0 : i32
    return %c0_i32, %arg0 : i32, i32
  }
}

</mosaic_0001>

<bundles_post_ra>
// kernel: tpu_custom_call.1
= control target key start
LH: loop header
LB: loop body
LE: loop exit
PB: predicated region body
PF: predicated region fallthrough
CT: control target
= control target key end

     0   :  { %9 = vsyncpa [#allocation6], 0  ;;  %s201_s0 = inlined_call_operand.vmem [shape: f32[2], index: 0, kind: input, shape index: {}]   ;;  %s202_s1 = inlined_call_operand.<no memory space> [shape: f32[1], index: 1, kind: input, shape index: {}]   ;;  %s203_s2 = inlined_call_operand.hbm [shape: f32[16,128], index: 2, kind: input, shape index: {}]   ;;  %s204_s3 = inlined_call_operand.hbm [shape: f32[8,128], index: 3, kind: output, shape index: {}]  }
   0x1   :  { %10 = vsyncpa [#allocation4], 0 }
   0x2   :  { %11 = vsyncpa [#allocation5], 0  ;;  %s18_s14 = sshll.u32 %s201_s0, 4  ;;  %s19_s14 = int_to_ptr.vmem [resolvable:$true] %s18_s14 }
   0x3   :  { %s84_s15 = scalar_lea.vmem %s19_s14, 16  ;;  %p89_p1 = scmp.lt.s32.totalorder %s19_s14, %s19_s14 }
   0x4   :  { %p85_p0 = scmp.ne.s32.totalorder %s19_s14, %s84_s15  ;;  %p90_p2 = scmp.lt.s32.totalorder %s84_s15, %s84_s15 }
   0x6   :  { %p91_p3 = por %p90_p2, %p89_p1 }
   0x8   :  { %p92_p4 = pnand %p91_p3, %p85_p0 }
   0xa   :  { %95 = shalt.err (!%p92_p4)
}
   0xb   :  { %s146_s16 = smov [#allocation3]   ;;  %s147_s17 = smov [#allocation7]  }
   0xc   :  { %21 = dma.vmem_to_smem %s19_s14, 16, %s146_s16, [#allocation6]  }
   0xd   :  { %s29_s18 = sshll.u32 %s147_s17, 4  ;;  %s96_s21 = scalar_lea.hbm %s203_s2, 256  ;;  %s30_s18 = int_to_ptr.vmem [resolvable:$true] %s29_s18 }
   0xe   :  { %p97_p5 = scmp.ne.s32.totalorder %s203_s2, %s96_s21  ;;  %p100_p6 = scmp.lt.u32.totalorder %s96_s21, %s203_s2 }
  0x10   :  { %p102_p7 = pnand %p100_p6, %p97_p5 }
  0x12   :  { %105 = shalt.err (!%p102_p7)
}
  0x13   :  { %s106_s25 = scalar_lea.vmem %s30_s18, 256  ;;  %p111_p9 = scmp.lt.s32.totalorder %s30_s18, %s30_s18 }
  0x14   :  { %p107_p8 = scmp.ne.s32.totalorder %s30_s18, %s106_s25  ;;  %p112_p10 = scmp.lt.s32.totalorder %s106_s25, %s106_s25 }
  0x16   :  { %p113_p11 = por %p112_p10, %p111_p9 }
  0x18   :  { %p114_p12 = pnand %p113_p11, %p107_p8 }
  0x1a   :  { %117 = shalt.err (!%p114_p12)
}
  0x1b   :  { %s148_s26 = smov 128   ;;  %s149_s27 = smov 8  }
  0x1c   :  { %35 = dma.hbm_to_vmem [thread:$0]  %s203_s2, 256, %s30_s18, [#allocation4], %s148_s26, %s148_s26, %s149_s27  }
  0x1d   :  { %140 = dma.done.wait [#allocation6], 16  }
  0x1e   :  { %141 = vsyncadd [#allocation6], 4294967280 }
  0x1f   :  { %142 = dma.done.wait [#allocation4], 256  }
  0x20   :  { %143 = vsyncadd [#allocation4], 4294967040 }
  0x21   :  { %42 = sfence }
  0x22   :  { %s43_s30 = sld [smem:[#allocation3]]  ;;  %s76_s4 = sld [smem:[#allocation3 + $0x1]]  ;;  %v44_v0 = vld [vmem:[#allocation7] sm:$0xff]  ;;  %v47_v1 = vld [vmem:[#allocation7 + $0x8] sm:$0xff]  ;;  %v53_v6 = vstv %s202_s1 }
  0x23   :  { %s150_s2 = smov [#allocation8]  }
  0x24   :  { %s66_s7 = sshll.u32 %s150_s2, 4  ;;  %s67_s7 = int_to_ptr.vmem [resolvable:$true] %s66_s7 }
  0x25   :  { %s118_s8 = scalar_lea.vmem %s67_s7, 128  ;;  %p123_p0 = scmp.lt.s32.totalorder %s67_s7, %s67_s7 }
  0x26   :  { %p119_p13 = scmp.ne.s32.totalorder %s67_s7, %s118_s8  ;;  %p124_p1 = scmp.lt.s32.totalorder %s118_s8, %s118_s8 }
  0x28   :  { %v45_v2 = vstv %s43_s30  ;;  %v49_v3 = vstv %s76_s4  ;;  %p125_p2 = por %p124_p1, %p123_p0 }
  0x29   :  { %v46_v4 = vmul.f32 %v45_v2, %v44_v0  ;;  %v50_v5 = vmul.f32 %v49_v3, %v47_v1 }
  0x2a   :  { %p126_p3 = pnand %p125_p2, %p119_p13 }
  0x2b   :  { %v51_v7 = vadd.f32 %v50_v5, %v46_v4 }
  0x2d   :  { %v54_v8 = vadd.f32 %v53_v6, %v51_v7 }
  0x2f   :  { %v55_v9 = vmul.f32 0.5, %v54_v8 }
  0x31   :  { %82 = vtanh.f32 %v55_v9 }
  0x3b   :  { %v83_v10 = vpop.eup %82 }
  0x3c   :  { %v57_v11 = vmul.f32 0.5, %v83_v10 }
  0x3e   :  { %v58_v12 = vadd.f32 0.5, %v57_v11 }
  0x40   :  { %59 = vst [vmem:[#allocation8] sm:$0xff] %v58_v12 }
  0x41   :  { %129 = shalt.err (!%p126_p3)
}
  0x42   :  { %s130_s10 = scalar_lea.hbm %s204_s3, 128 }
  0x43   :  { %p131_p4 = scmp.ne.s32.totalorder %s204_s3, %s130_s10  ;;  %p134_p5 = scmp.lt.u32.totalorder %s130_s10, %s204_s3 }
  0x45   :  { %p136_p6 = pnand %p134_p5, %p131_p4 }
  0x47   :  { %139 = shalt.err (!%p136_p6)
}
  0x48   :  { %69 = dma.vmem_to_hbm [thread:$0]  %s67_s7, 128, %s204_s3, [#allocation5]  }
  0x49   :  { %144 = dma.done.wait [#allocation5], 128  }
  0x4a   :  { %145 = vsyncadd [#allocation5], 4294967168 }
  0x4b   :  { %73 = vsyncpa [#allocation4], 1 }
  0x4c   :  { %74 = vsyncpa [#allocation5], 1 }
  0x4d   :  { %75 = vsyncpa [#allocation6], 1 }

</bundles_post_ra>
